<compile_context>
chip_gen: v6e
topology: v6e:2x2x1
jax: 0.10.0
libtpu: 0.0.40
codegen_flags: <defaults>
</compile_context>

<pallas_src>
import functools

import jax
import jax.numpy as jnp
from jax import lax
from jax.experimental import pallas as pl
from jax.experimental.pallas import tpu as pltpu


# ------------------------------- helpers -----------------------------------

def _row_tile(m, target=256):
    """Largest row tile <= target dividing m (multiple of 8), else full m."""
    if m <= target:
        return m
    for t in (target, 128, 64, 32, 16, 8):
        if m % t == 0:
            return t
    return m


def _gelu_f32(x):
    # tanh-approx GELU (BERT's erf GELU differs by <1e-3 for typical activations)
    c = 0.7978845608028654
    return 0.5 * x * (1.0 + jnp.tanh(c * (x + 0.044715 * x * x * x)))


# ------------------------------- kernels ------------------------------------

def _layernorm_kernel(x_ref, g_ref, b_ref, o_ref, *, eps):
    x = x_ref[...].astype(jnp.float32)
    mu = jnp.mean(x, axis=-1, keepdims=True)
    var = jnp.mean(jnp.square(x - mu), axis=-1, keepdims=True)
    y = (x - mu) * lax.rsqrt(var + eps)
    o_ref[...] = (y * g_ref[...] + b_ref[...]).astype(o_ref.dtype)


def layernorm(x2d, gamma2d, beta2d, out_dtype, eps=1e-12):
    m, h = x2d.shape
    tm = _row_tile(m)
    return pl.pallas_call(
        functools.partial(_layernorm_kernel, eps=eps),
        out_shape=jax.ShapeDtypeStruct((m, h), out_dtype),
        grid=(m // tm,),
        in_specs=[
            pl.BlockSpec((tm, h), lambda i: (i, 0)),
            pl.BlockSpec((1, h), lambda i: (0, 0)),
            pl.BlockSpec((1, h), lambda i: (0, 0)),
        ],
        out_specs=pl.BlockSpec((tm, h), lambda i: (i, 0)),
        compiler_params=pltpu.CompilerParams(dimension_semantics=("parallel",)),
    )(x2d, gamma2d, beta2d)


def _attn_block_kernel(x_ref, wqkv_ref, bqkv_ref, wo_ref, bo_ref, g_ref, b_ref,
                       m_ref, o_ref, qkv_scr, *, num_heads, scale, eps):
    """Fused: QKV projection -> per-head attention -> out-proj -> +bias+residual -> LN."""
    x = x_ref[0]                                       # (S, H), compute dtype (bf16)
    seq, hid = x.shape
    dh = hid // num_heads

    # Single (S,H) @ (H,3H) MXU matmul with f32 accumulation; stash in VMEM scratch.
    qkv = jnp.dot(x, wqkv_ref[...], preferred_element_type=jnp.float32) + bqkv_ref[...]
    qkv_scr[...] = qkv.astype(qkv_scr.dtype)

    bias = m_ref[0].astype(jnp.float32)                # (1, S) additive key mask

    attn = jnp.zeros((seq, hid), jnp.float32)
    for h in range(num_heads):                         # static unroll over heads
        q = qkv_scr[:, h * dh:(h + 1) * dh]            # (S, Dh)
        k = qkv_scr[:, hid + h * dh:hid + (h + 1) * dh]
        v = qkv_scr[:, 2 * hid + h * dh:2 * hid + (h + 1) * dh]
        # q @ k^T contracting last dims -> no materialized transpose.
        s = lax.dot_general(q, k, (((1,), (1,)), ((), ())),
                            preferred_element_type=jnp.float32) * scale + bias
        s = s - jnp.max(s, axis=-1, keepdims=True)
        p = jnp.exp(s)
        p = p * pl.reciprocal(jnp.sum(p, axis=-1, keepdims=True), approx=True)
        ctx = jnp.dot(p.astype(v.dtype), v, preferred_element_type=jnp.float32)   # (S, Dh)
        # Fold the output projection per head:  sum_h ctx_h @ Wo[h*Dh:(h+1)*Dh, :]
        attn = attn + jnp.dot(ctx.astype(x.dtype), wo_ref[h * dh:(h + 1) * dh, :],
                              preferred_element_type=jnp.float32)

    # bias + residual + LayerNorm epilogue (f32 math).
    y = attn + bo_ref[...] + x.astype(jnp.float32)
    mu = jnp.mean(y, axis=-1, keepdims=True)
    var = jnp.mean(jnp.square(y - mu), axis=-1, keepdims=True)
    y = (y - mu) * lax.rsqrt(var + eps)
    o_ref[0] = (y * g_ref[...] + b_ref[...]).astype(o_ref.dtype)


def attention_block(x, wqkv, bqkv, wo, bo, g, b, mbias, *, num_heads, scale, eps=1e-12):
    B, S, H = x.shape
    return pl.pallas_call(
        functools.partial(_attn_block_kernel, num_heads=num_heads, scale=scale, eps=eps),
        out_shape=jax.ShapeDtypeStruct((B, S, H), x.dtype),
        grid=(B,),
        in_specs=[
            pl.BlockSpec((1, S, H), lambda i: (i, 0, 0)),
            pl.BlockSpec((H, 3 * H), lambda i: (0, 0)),
            pl.BlockSpec((1, 3 * H), lambda i: (0, 0)),
            pl.BlockSpec((H, H), lambda i: (0, 0)),
            pl.BlockSpec((1, H), lambda i: (0, 0)),
            pl.BlockSpec((1, H), lambda i: (0, 0)),
            pl.BlockSpec((1, H), lambda i: (0, 0)),
            pl.BlockSpec((1, 1, S), lambda i: (i, 0, 0)),
        ],
        out_specs=pl.BlockSpec((1, S, H), lambda i: (i, 0, 0)),
        scratch_shapes=[pltpu.VMEM((S, 3 * H), x.dtype)],
        compiler_params=pltpu.CompilerParams(dimension_semantics=("parallel",)),
    )(x, wqkv, bqkv, wo, bo, g, b, mbias)


def _ffn_block_kernel(x_ref, w1_ref, b1_ref, w2_ref, b2_ref, g_ref, b_ref, o_ref, *, eps):
    """Fused: x@W1+b1 -> GELU -> @W2+b2 -> +residual -> LayerNorm."""
    x = x_ref[...]                                     # (tm, H), compute dtype
    h = jnp.dot(x, w1_ref[...], preferred_element_type=jnp.float32) + b1_ref[...]
    h = _gelu_f32(h)
    y = jnp.dot(h.astype(x.dtype), w2_ref[...], preferred_element_type=jnp.float32) + b2_ref[...]
    y = y + x.astype(jnp.float32)
    mu = jnp.mean(y, axis=-1, keepdims=True)
    var = jnp.mean(jnp.square(y - mu), axis=-1, keepdims=True)
    y = (y - mu) * lax.rsqrt(var + eps)
    o_ref[...] = (y * g_ref[...] + b_ref[...]).astype(o_ref.dtype)


def ffn_block(x2d, w1, b1, w2, b2, g, b, eps=1e-12):
    m, H = x2d.shape
    I = w1.shape[1]
    tm = _row_tile(m)
    return pl.pallas_call(
        functools.partial(_ffn_block_kernel, eps=eps),
        out_shape=jax.ShapeDtypeStruct((m, H), x2d.dtype),
        grid=(m // tm,),
        in_specs=[
            pl.BlockSpec((tm, H), lambda i: (i, 0)),
            pl.BlockSpec((H, I), lambda i: (0, 0)),
            pl.BlockSpec((1, I), lambda i: (0, 0)),
            pl.BlockSpec((I, H), lambda i: (0, 0)),
            pl.BlockSpec((1, H), lambda i: (0, 0)),
            pl.BlockSpec((1, H), lambda i: (0, 0)),
            pl.BlockSpec((1, H), lambda i: (0, 0)),
        ],
        out_specs=pl.BlockSpec((tm, H), lambda i: (i, 0)),
        compiler_params=pltpu.CompilerParams(dimension_semantics=("parallel",)),
    )(x2d, w1, b1, w2, b2, g, b)


def _classifier_kernel(x_ref, w_ref, b_ref, o_ref):
    y = jnp.dot(x_ref[...], w_ref[...], preferred_element_type=jnp.float32) + b_ref[...]
    o_ref[...] = y.astype(o_ref.dtype)


def classifier(x2d, w_pad, b_pad):
    """w_pad: (H, Lp) with Lp a multiple of 128 -> lane-dense output stores."""
    m, H = x2d.shape
    n = w_pad.shape[1]
    tm = _row_tile(m)
    return pl.pallas_call(
        _classifier_kernel,
        out_shape=jax.ShapeDtypeStruct((m, n), jnp.float32),
        grid=(m // tm,),
        in_specs=[
            pl.BlockSpec((tm, H), lambda i: (i, 0)),
            pl.BlockSpec((H, n), lambda i: (0, 0)),
            pl.BlockSpec((1, n), lambda i: (0, 0)),
        ],
        out_specs=pl.BlockSpec((tm, n), lambda i: (i, 0)),
        compiler_params=pltpu.CompilerParams(dimension_semantics=("parallel",)),
    )(x2d, w_pad, b_pad)


# ------------------------------ model (glue) --------------------------------

CFG = dict(
    vocab_size=100,
    type_vocab_size=2,
    max_position=16,
    hidden=32,
    heads=2,
    intermediate=64,
    num_layers=2,
    num_labels=3,
    seq=8,
    batch=2,
)


def init_params(key, cfg):
    H, I = cfg["hidden"], cfg["intermediate"]
    V, P, T = cfg["vocab_size"], cfg["max_position"], cfg["type_vocab_size"]
    L, nL = cfg["num_labels"], cfg["num_layers"]

    keys = iter(jax.random.split(key, 16 + 16 * nL))

    def rnd(shape, std=0.02):
        return (std * jax.random.normal(next(keys), shape)).astype(jnp.float32)

    params = {
        "word_emb": rnd((V, H)),
        "pos_emb": rnd((P, H)),
        "type_emb": rnd((T, H)),
        "emb_ln_g": jnp.ones((H,), jnp.float32),
        "emb_ln_b": jnp.zeros((H,), jnp.float32),
        "cls_w": rnd((H, L)),
        "cls_b": jnp.zeros((L,), jnp.float32),
        "layers": [],
    }
    for _ in range(nL):
        params["layers"].append({
            "wq": rnd((H, H)), "bq": jnp.zeros((H,), jnp.float32),
            "wk": rnd((H, H)), "bk": jnp.zeros((H,), jnp.float32),
            "wv": rnd((H, H)), "bv": jnp.zeros((H,), jnp.float32),
            "wo": rnd((H, H)), "bo": jnp.zeros((H,), jnp.float32),
            "ln1_g": jnp.ones((H,), jnp.float32), "ln1_b": jnp.zeros((H,), jnp.float32),
            "w1": rnd((H, I)), "b1": jnp.zeros((I,), jnp.float32),
            "w2": rnd((I, H)), "b2": jnp.zeros((H,), jnp.float32),
            "ln2_g": jnp.ones((H,), jnp.float32), "ln2_b": jnp.zeros((H,), jnp.float32),
        })
    return params


def prepare_params(params, cfg, compute_dtype=jnp.bfloat16):
    """One-time weight repack: fused QKV, bf16 matmul weights, f32 biases/LN params,
    lane-dense (padded to 128) classifier weight."""
    H, L = cfg["hidden"], cfg["num_labels"]
    Lp = ((L + 127) // 128) * 128
    cls_w = jnp.zeros((H, Lp), jnp.float32).at[:, :L].set(params["cls_w"]).astype(compute_dtype)
    cls_b = jnp.zeros((1, Lp), jnp.float32).at[0, :L].set(params["cls_b"])

    fused = {
        "word_emb": params["word_emb"],
        "pos_emb": params["pos_emb"],
        "type_emb": params["type_emb"],
        "emb_ln_g": params["emb_ln_g"][None, :],
        "emb_ln_b": params["emb_ln_b"][None, :],
        "cls_w": cls_w,
        "cls_b": cls_b,
        "layers": [],
    }
    for lyr in params["layers"]:
        fused["layers"].append({
            "wqkv": jnp.concatenate([lyr["wq"], lyr["wk"], lyr["wv"]], axis=1).astype(compute_dtype),
            "bqkv": jnp.concatenate([lyr["bq"], lyr["bk"], lyr["bv"]])[None, :],
            "wo": lyr["wo"].astype(compute_dtype),
            "bo": lyr["bo"][None, :],
            "ln1_g": lyr["ln1_g"][None, :],
            "ln1_b": lyr["ln1_b"][None, :],
            "w1": lyr["w1"].astype(compute_dtype),
            "b1": lyr["b1"][None, :],
            "w2": lyr["w2"].astype(compute_dtype),
            "b2": lyr["b2"][None, :],
            "ln2_g": lyr["ln2_g"][None, :],
            "ln2_b": lyr["ln2_b"][None, :],
        })
    return fused


def bert_lstm_classification_forward(fparams, input_ids, attention_mask,
                                     token_type_ids, cfg,
                                     compute_dtype=jnp.bfloat16):
    B, S = input_ids.shape
    H, nH, L = cfg["hidden"], cfg["heads"], cfg["num_labels"]
    Dh = H // nH
    M = B * S

    # --- embeddings: gather + sum in JAX glue (no clean Pallas gather), LN in Pallas ---
    pos_ids = jnp.arange(S)
    emb = (jnp.take(fparams["word_emb"], input_ids, axis=0)
           + fparams["pos_emb"][pos_ids][None, :, :]
           + jnp.take(fparams["type_emb"], token_type_ids, axis=0))       # (B, S, H) f32
    x2d = layernorm(emb.reshape(M, H), fparams["emb_ln_g"], fparams["emb_ln_b"],
                    out_dtype=compute_dtype)

    # extended attention mask: (1 - mask) * -10000, shape (B, 1, S)
    mbias = ((1.0 - attention_mask.astype(jnp.float32)) * -10000.0)[:, None, :]

    scale = 1.0 / (Dh ** 0.5)
    x = x2d.reshape(B, S, H)
    for lyr in fparams["layers"]:
        # fused: QKV proj + attention + out-proj + residual + LN1   (one pallas_call)
        x = attention_block(x, lyr["wqkv"], lyr["bqkv"], lyr["wo"], lyr["bo"],
                            lyr["ln1_g"], lyr["ln1_b"], mbias,
                            num_heads=nH, scale=scale)
        # fused: FFN (w1+GELU+w2) + residual + LN2                  (one pallas_call)
        x = ffn_block(x.reshape(M, H), lyr["w1"], lyr["b1"], lyr["w2"], lyr["b2"],
                      lyr["ln2_g"], lyr["ln2_b"]).reshape(B, S, H)

    # dropout -> identity in eval mode
    # TODO(synk): self.lstm is instantiated in __init__ but never used in forward(); omitted.
    logits_padded = classifier(x.reshape(M, H), fparams["cls_w"], fparams["cls_b"])
    return logits_padded[:, :L].reshape(B, S, L)


# ---------------------------------- main -------------------------------------

if __name__ == "__main__":
    cfg = CFG
    key = jax.random.PRNGKey(0)
    k_param, k_ids = jax.random.split(key)

    params = init_params(k_param, cfg)
    fparams = prepare_params(params, cfg, compute_dtype=jnp.bfloat16)

    B, S = cfg["batch"], cfg["seq"]
    input_ids = jax.random.randint(k_ids, (B, S), 0, cfg["vocab_size"], dtype=jnp.int32)
    attention_mask = jnp.ones((B, S), jnp.int32).at[1, S - 2:].set(0)   # mask 2 pad tokens
    token_type_ids = jnp.zeros((B, S), jnp.int32)

    fwd = jax.jit(functools.partial(bert_lstm_classification_forward, cfg=cfg))
    logits = fwd(fparams, input_ids, attention_mask, token_type_ids)
    logits = jax.block_until_ready(logits)

    assert logits.shape == (B, S, cfg["num_labels"])
    assert jnp.all(jnp.isfinite(logits))
    print("KERNEL_OK")
</pallas_src>

<mosaic_0001>
module attributes {stable_mosaic.version = 11 : i64} {
  func.func @_classifier_kernel(%arg0: i32, %arg1: memref<16x32xbf16, #tpu.memory_space<vmem>>, %arg2: memref<32x128xbf16, #tpu.memory_space<vmem>>, %arg3: memref<1x128xf32, #tpu.memory_space<vmem>>, %arg4: memref<16x128xf32, #tpu.memory_space<vmem>>) attributes {dimension_semantics = [#tpu.dimension_semantics<parallel>], iteration_bounds = array<i64: 1>, scalar_prefetch = 0 : i64, scratch_operands = 0 : i64, tpu.core_type = #tpu.core_type<tc>, window_params = [{transform_indices = @transform_0, window_bounds = array<i64: 16, 32>}, {pipeline_mode = #tpu.pipeline_mode<synchronous>, transform_indices = @transform_1, window_bounds = array<i64: 32, 128>}, {pipeline_mode = #tpu.pipeline_mode<synchronous>, transform_indices = @transform_2, window_bounds = array<i64: 1, 128>}, {transform_indices = @transform_3, window_bounds = array<i64: 16, 128>}]} {
    %c0 = arith.constant 0 : index
    %c0_0 = arith.constant 0 : index
    %0 = vector.load %arg1[%c0, %c0_0] : memref<16x32xbf16, #tpu.memory_space<vmem>>, vector<16x32xbf16>
    %c0_1 = arith.constant 0 : index
    %c0_2 = arith.constant 0 : index
    %1 = vector.load %arg2[%c0_1, %c0_2] : memref<32x128xbf16, #tpu.memory_space<vmem>>, vector<32x128xbf16>
    %cst = arith.constant dense<0.000000e+00> : vector<16x128xf32>
    %2 = tpu.matmul %0, %1, %cst {dimension_numbers = #tpu.dot_dimension_numbers<[1], [0], [0], [1], [0, 0, 1, 1], [], []>} : vector<16x32xbf16>, vector<32x128xbf16>, vector<16x128xf32> -> vector<16x128xf32>
    %c0_3 = arith.constant 0 : index
    %c0_4 = arith.constant 0 : index
    %3 = vector.load %arg3[%c0_3, %c0_4] : memref<1x128xf32, #tpu.memory_space<vmem>>, vector<1x128xf32>
    %4 = vector.broadcast %3 : vector<1x128xf32> to vector<16x128xf32>
    %5 = arith.addf %2, %4 : vector<16x128xf32>
    %c0_5 = arith.constant 0 : index
    %c0_6 = arith.constant 0 : index
    %6 = vector.load %arg4[%c0_5, %c0_6] : memref<16x128xf32, #tpu.memory_space<vmem>>, vector<16x128xf32>
    tpu.vector_store %arg4[%c0_5, %c0_6], %5 {strides = array<i32>} : memref<16x128xf32, #tpu.memory_space<vmem>>, vector<16x128xf32>,
    return
  }
  func.func @transform_0(%arg0: i32) -> (i32, i32) {
    %c0_i32 = arith.constant 0 : i32
    %c0_i32_0 = arith.constant 0 : i32
    return %arg0, %c0_i32 : i32, i32
  }
  func.func @transform_1(%arg0: i32) -> (i32, i32) {
    %c0_i32 = arith.constant 0 : i32
    %c0_i32_0 = arith.constant 0 : i32
    %c0_i32_1 = arith.constant 0 : i32
    return %c0_i32, %c0_i32_0 : i32, i32
  }
  func.func @transform_2(%arg0: i32) -> (i32, i32) {
    %c0_i32 = arith.constant 0 : i32
    %c0_i32_0 = arith.constant 0 : i32
    %c0_i32_1 = arith.constant 0 : i32
    return %c0_i32, %c0_i32_0 : i32, i32
  }
  func.func @transform_3(%arg0: i32) -> (i32, i32) {
    %c0_i32 = arith.constant 0 : i32
    %c0_i32_0 = arith.constant 0 : i32
    return %arg0, %c0_i32 : i32, i32
  }
}

module attributes {stable_mosaic.version = 11 : i64} {
  func.func @_attn_block_kernel(%arg0: i32, %arg1: memref<1x8x32xbf16, #tpu.memory_space<vmem>>, %arg2: memref<32x96xbf16, #tpu.memory_space<vmem>>, %arg3: memref<1x96xf32, #tpu.memory_space<vmem>>, %arg4: memref<32x32xbf16, #tpu.memory_space<vmem>>, %arg5: memref<1x32xf32, #tpu.memory_space<vmem>>, %arg6: memref<1x32xf32, #tpu.memory_space<vmem>>, %arg7: memref<1x32xf32, #tpu.memory_space<vmem>>, %arg8: memref<1x1x8xf32, #tpu.memory_space<vmem>>, %arg9: memref<1x8x32xbf16, #tpu.memory_space<vmem>>, %arg10: memref<8x96xbf16, #tpu.memory_space<vmem>>) attributes {dimension_semantics = [#tpu.dimension_semantics<parallel>], iteration_bounds = array<i64: 2>, scalar_prefetch = 0 : i64, scratch_operands = 1 : i64, tpu.core_type = #tpu.core_type<tc>, window_params = [{transform_indices = @transform_0, window_bounds = array<i64: 1, 8, 32>}, {pipeline_mode = #tpu.pipeline_mode<synchronous>, transform_indices = @transform_1, window_bounds = array<i64: 32, 96>}, {pipeline_mode = #tpu.pipeline_mode<synchronous>, transform_indices = @transform_2, window_bounds = array<i64: 1, 96>}, {pipeline_mode = #tpu.pipeline_mode<synchronous>, transform_indices = @transform_3, window_bounds = array<i64: 32, 32>}, {pipeline_mode = #tpu.pipeline_mode<synchronous>, transform_indices = @transform_4, window_bounds = array<i64: 1, 32>}, {pipeline_mode = #tpu.pipeline_mode<synchronous>, transform_indices = @transform_5, window_bounds = array<i64: 1, 32>}, {pipeline_mode = #tpu.pipeline_mode<synchronous>, transform_indices = @transform_6, window_bounds = array<i64: 1, 32>}, {transform_indices = @transform_7, window_bounds = array<i64: 1, 1, 8>}, {transform_indices = @transform_8, window_bounds = array<i64: 1, 8, 32>}]} {
    %c0 = arith.constant 0 : index
    %c0_0 = arith.constant 0 : index
    %c0_1 = arith.constant 0 : index
    %0 = vector.load %arg1[%c0, %c0_0, %c0_1] : memref<1x8x32xbf16, #tpu.memory_space<vmem>>, vector<1x8x32xbf16>
    %1 = vector.shape_cast %0 : vector<1x8x32xbf16> to vector<8x32xbf16>
    %c0_2 = arith.constant 0 : index
    %c0_3 = arith.constant 0 : index
    %2 = vector.load %arg2[%c0_2, %c0_3] : memref<32x96xbf16, #tpu.memory_space<vmem>>, vector<32x96xbf16>
    %cst = arith.constant dense<0.000000e+00> : vector<8x96xf32>
    %3 = tpu.matmul %1, %2, %cst {dimension_numbers = #tpu.dot_dimension_numbers<[1], [0], [0], [1], [0, 0, 1, 1], [], []>} : vector<8x32xbf16>, vector<32x96xbf16>, vector<8x96xf32> -> vector<8x96xf32>
    %c0_4 = arith.constant 0 : index
    %c0_5 = arith.constant 0 : index
    %4 = vector.load %arg3[%c0_4, %c0_5] : memref<1x96xf32, #tpu.memory_space<vmem>>, vector<1x96xf32>
    %5 = vector.broadcast %4 : vector<1x96xf32> to vector<8x96xf32>
    %6 = arith.addf %3, %5 : vector<8x96xf32>
    %7 = arith.truncf %6 : vector<8x96xf32> to vector<8x96xbf16>
    %c0_6 = arith.constant 0 : index
    %c0_7 = arith.constant 0 : index
    %8 = vector.load %arg10[%c0_6, %c0_7] : memref<8x96xbf16, #tpu.memory_space<vmem>>, vector<8x96xbf16>
    tpu.vector_store %arg10[%c0_6, %c0_7], %7 {strides = array<i32>} : memref<8x96xbf16, #tpu.memory_space<vmem>>, vector<8x96xbf16>,
    %c0_8 = arith.constant 0 : index
    %c0_9 = arith.constant 0 : index
    %c0_10 = arith.constant 0 : index
    %9 = vector.load %arg8[%c0_8, %c0_9, %c0_10] : memref<1x1x8xf32, #tpu.memory_space<vmem>>, vector<1x1x8xf32>
    %10 = vector.shape_cast %9 : vector<1x1x8xf32> to vector<1x8xf32>
    %cst_11 = arith.constant 0.000000e+00 : f32
    %11 = vector.broadcast %cst_11 : f32 to vector<8x32xf32>
    %c0_12 = arith.constant 0 : index
    %c0_13 = arith.constant 0 : index
    %12 = vector.load %arg10[%c0_12, %c0_13] : memref<8x96xbf16, #tpu.memory_space<vmem>>, vector<8x16xbf16>
    %c0_14 = arith.constant 0 : index
    %c32 = arith.constant 32 : index
    %13 = vector.load %arg10[%c0_14, %c32] : memref<8x96xbf16, #tpu.memory_space<vmem>>, vector<8x16xbf16>
    %c0_15 = arith.constant 0 : index
    %c64 = arith.constant 64 : index
    %14 = vector.load %arg10[%c0_15, %c64] : memref<8x96xbf16, #tpu.memory_space<vmem>>, vector<8x16xbf16>
    %cst_16 = arith.constant dense<0.000000e+00> : vector<8x8xf32>
    %15 = tpu.matmul %12, %13, %cst_16 {dimension_numbers = #tpu.dot_dimension_numbers<[1], [1], [0], [0], [0, 0, 1, 0], [], []>} : vector<8x16xbf16>, vector<8x16xbf16>, vector<8x8xf32> -> vector<8x8xf32>
    %cst_17 = arith.constant 2.500000e-01 : f32
    %16 = vector.broadcast %cst_17 : f32 to vector<8x8xf32>
    %17 = arith.mulf %15, %16 : vector<8x8xf32>
    %18 = vector.broadcast %10 : vector<1x8xf32> to vector<8x8xf32>
    %19 = arith.addf %17, %18 : vector<8x8xf32>
    %cst_18 = arith.constant dense<0xFF800000> : vector<8xf32>
    %20 = vector.multi_reduction <maximumf>, %19, %cst_18 [1] : vector<8x8xf32> to vector<8xf32>
    %21 = vector.shape_cast %20 : vector<8xf32> to vector<8x1xf32>
    %22 = vector.broadcast %21 : vector<8x1xf32> to vector<8x8xf32>
    %23 = arith.subf %19, %22 : vector<8x8xf32>
    %24 = math.exp %23 : vector<8x8xf32>
    %cst_19 = arith.constant dense<0.000000e+00> : vector<8xf32>
    %25 = vector.multi_reduction <add>, %24, %cst_19 [1] : vector<8x8xf32> to vector<8xf32>
    %26 = vector.shape_cast %25 : vector<8xf32> to vector<8x1xf32>
    %27 = tpu.reciprocal %26 {approx = true} : vector<8x1xf32> -> vector<8x1xf32>
    %28 = vector.broadcast %27 : vector<8x1xf32> to vector<8x8xf32>
    %29 = arith.mulf %24, %28 : vector<8x8xf32>
    %30 = arith.truncf %29 : vector<8x8xf32> to vector<8x8xbf16>
    %cst_20 = arith.constant dense<0.000000e+00> : vector<8x16xf32>
    %31 = tpu.matmul %30, %14, %cst_20 {dimension_numbers = #tpu.dot_dimension_numbers<[1], [0], [0], [1], [0, 0, 1, 1], [], []>} : vector<8x8xbf16>, vector<8x16xbf16>, vector<8x16xf32> -> vector<8x16xf32>
    %32 = arith.truncf %31 : vector<8x16xf32> to vector<8x16xbf16>
    %c0_21 = arith.constant 0 : index
    %c0_22 = arith.constant 0 : index
    %33 = vector.load %arg4[%c0_21, %c0_22] : memref<32x32xbf16, #tpu.memory_space<vmem>>, vector<16x32xbf16>
    %cst_23 = arith.constant dense<0.000000e+00> : vector<8x32xf32>
    %34 = tpu.matmul %32, %33, %cst_23 {dimension_numbers = #tpu.dot_dimension_numbers<[1], [0], [0], [1], [0, 0, 1, 1], [], []>} : vector<8x16xbf16>, vector<16x32xbf16>, vector<8x32xf32> -> vector<8x32xf32>
    %35 = arith.addf %11, %34 : vector<8x32xf32>
    %c0_24 = arith.constant 0 : index
    %c16 = arith.constant 16 : index
    %36 = vector.load %arg10[%c0_24, %c16] : memref<8x96xbf16, #tpu.memory_space<vmem>>, vector<8x16xbf16>
    %c0_25 = arith.constant 0 : index
    %c48 = arith.constant 48 : index
    %37 = vector.load %arg10[%c0_25, %c48] : memref<8x96xbf16, #tpu.memory_space<vmem>>, vector<8x16xbf16>
    %c0_26 = arith.constant 0 : index
    %c80 = arith.constant 80 : index
    %38 = vector.load %arg10[%c0_26, %c80] : memref<8x96xbf16, #tpu.memory_space<vmem>>, vector<8x16xbf16>
    %cst_27 = arith.constant dense<0.000000e+00> : vector<8x8xf32>
    %39 = tpu.matmul %36, %37, %cst_27 {dimension_numbers = #tpu.dot_dimension_numbers<[1], [1], [0], [0], [0, 0, 1, 0], [], []>} : vector<8x16xbf16>, vector<8x16xbf16>, vector<8x8xf32> -> vector<8x8xf32>
    %cst_28 = arith.constant 2.500000e-01 : f32
    %40 = vector.broadcast %cst_28 : f32 to vector<8x8xf32>
    %41 = arith.mulf %39, %40 : vector<8x8xf32>
    %42 = vector.broadcast %10 : vector<1x8xf32> to vector<8x8xf32>
    %43 = arith.addf %41, %42 : vector<8x8xf32>
    %cst_29 = arith.constant dense<0xFF800000> : vector<8xf32>
    %44 = vector.multi_reduction <maximumf>, %43, %cst_29 [1] : vector<8x8xf32> to vector<8xf32>
    %45 = vector.shape_cast %44 : vector<8xf32> to vector<8x1xf32>
    %46 = vector.broadcast %45 : vector<8x1xf32> to vector<8x8xf32>
    %47 = arith.subf %43, %46 : vector<8x8xf32>
    %48 = math.exp %47 : vector<8x8xf32>
    %cst_30 = arith.constant dense<0.000000e+00> : vector<8xf32>
    %49 = vector.multi_reduction <add>, %48, %cst_30 [1] : vector<8x8xf32> to vector<8xf32>
    %50 = vector.shape_cast %49 : vector<8xf32> to vector<8x1xf32>
    %51 = tpu.reciprocal %50 {approx = true} : vector<8x1xf32> -> vector<8x1xf32>
    %52 = vector.broadcast %51 : vector<8x1xf32> to vector<8x8xf32>
    %53 = arith.mulf %48, %52 : vector<8x8xf32>
    %54 = arith.truncf %53 : vector<8x8xf32> to vector<8x8xbf16>
    %cst_31 = arith.constant dense<0.000000e+00> : vector<8x16xf32>
    %55 = tpu.matmul %54, %38, %cst_31 {dimension_numbers = #tpu.dot_dimension_numbers<[1], [0], [0], [1], [0, 0, 1, 1], [], []>} : vector<8x8xbf16>, vector<8x16xbf16>, vector<8x16xf32> -> vector<8x16xf32>
    %56 = arith.truncf %55 : vector<8x16xf32> to vector<8x16xbf16>
    %c16_32 = arith.constant 16 : index
    %c0_33 = arith.constant 0 : index
    %57 = vector.load %arg4[%c16_32, %c0_33] : memref<32x32xbf16, #tpu.memory_space<vmem>>, vector<16x32xbf16>
    %cst_34 = arith.constant dense<0.000000e+00> : vector<8x32xf32>
    %58 = tpu.matmul %56, %57, %cst_34 {dimension_numbers = #tpu.dot_dimension_numbers<[1], [0], [0], [1], [0, 0, 1, 1], [], []>} : vector<8x16xbf16>, vector<16x32xbf16>, vector<8x32xf32> -> vector<8x32xf32>
    %59 = arith.addf %35, %58 : vector<8x32xf32>
    %c0_35 = arith.constant 0 : index
    %c0_36 = arith.constant 0 : index
    %60 = vector.load %arg5[%c0_35, %c0_36] : memref<1x32xf32, #tpu.memory_space<vmem>>, vector<1x32xf32>
    %61 = vector.broadcast %60 : vector<1x32xf32> to vector<8x32xf32>
    %62 = arith.addf %59, %61 : vector<8x32xf32>
    %63 = arith.extf %1 : vector<8x32xbf16> to vector<8x32xf32>
    %64 = arith.addf %62, %63 : vector<8x32xf32>
    %cst_37 = arith.constant dense<0.000000e+00> : vector<8xf32>
    %65 = vector.multi_reduction <add>, %64, %cst_37 [1] : vector<8x32xf32> to vector<8xf32>
    %66 = vector.shape_cast %65 : vector<8xf32> to vector<8x1xf32>
    %cst_38 = arith.constant 3.200000e+01 : f32
    %67 = vector.broadcast %cst_38 : f32 to vector<8x1xf32>
    %68 = arith.divf %66, %67 : vector<8x1xf32>
    %69 = vector.broadcast %68 : vector<8x1xf32> to vector<8x32xf32>
    %70 = arith.subf %64, %69 : vector<8x32xf32>
    %71 = arith.mulf %70, %70 : vector<8x32xf32>
    %cst_39 = arith.constant dense<0.000000e+00> : vector<8xf32>
    %72 = vector.multi_reduction <add>, %71, %cst_39 [1] : vector<8x32xf32> to vector<8xf32>
    %73 = vector.shape_cast %72 : vector<8xf32> to vector<8x1xf32>
    %cst_40 = arith.constant 3.200000e+01 : f32
    %74 = vector.broadcast %cst_40 : f32 to vector<8x1xf32>
    %75 = arith.divf %73, %74 : vector<8x1xf32>
    %76 = vector.broadcast %68 : vector<8x1xf32> to vector<8x32xf32>
    %77 = arith.subf %64, %76 : vector<8x32xf32>
    %cst_41 = arith.constant 9.99999996E-13 : f32
    %78 = vector.broadcast %cst_41 : f32 to vector<8x1xf32>
    %79 = arith.addf %75, %78 : vector<8x1xf32>
    %80 = math.rsqrt %79 : vector<8x1xf32>
    %81 = vector.broadcast %80 : vector<8x1xf32> to vector<8x32xf32>
    %82 = arith.mulf %77, %81 : vector<8x32xf32>
    %c0_42 = arith.constant 0 : index
    %c0_43 = arith.constant 0 : index
    %83 = vector.load %arg6[%c0_42, %c0_43] : memref<1x32xf32, #tpu.memory_space<vmem>>, vector<1x32xf32>
    %84 = vector.broadcast %83 : vector<1x32xf32> to vector<8x32xf32>
    %85 = arith.mulf %82, %84 : vector<8x32xf32>
    %c0_44 = arith.constant 0 : index
    %c0_45 = arith.constant 0 : index
    %86 = vector.load %arg7[%c0_44, %c0_45] : memref<1x32xf32, #tpu.memory_space<vmem>>, vector<1x32xf32>
    %87 = vector.broadcast %86 : vector<1x32xf32> to vector<8x32xf32>
    %88 = arith.addf %85, %87 : vector<8x32xf32>
    %89 = arith.truncf %88 : vector<8x32xf32> to vector<8x32xbf16>
    %c0_46 = arith.constant 0 : index
    %c0_47 = arith.constant 0 : index
    %c0_48 = arith.constant 0 : index
    %90 = vector.load %arg9[%c0_46, %c0_47, %c0_48] : memref<1x8x32xbf16, #tpu.memory_space<vmem>>, vector<1x8x32xbf16>
    %91 = vector.shape_cast %90 : vector<1x8x32xbf16> to vector<8x32xbf16>
    %92 = vector.shape_cast %89 : vector<8x32xbf16> to vector<1x8x32xbf16>
    tpu.vector_store %arg9[%c0_46, %c0_47, %c0_48], %92 {strides = array<i32>} : memref<1x8x32xbf16, #tpu.memory_space<vmem>>, vector<1x8x32xbf16>,
    return
  }
  func.func @transform_0(%arg0: i32) -> (i32, i32, i32) {
    %c0_i32 = arith.constant 0 : i32
    %c0_i32_0 = arith.constant 0 : i32
    %c0_i32_1 = arith.constant 0 : i32
    return %arg0, %c0_i32, %c0_i32_0 : i32, i32, i32
  }
  func.func @transform_1(%arg0: i32) -> (i32, i32) {
    %c0_i32 = arith.constant 0 : i32
    %c0_i32_0 = arith.constant 0 : i32
    %c0_i32_1 = arith.constant 0 : i32
    return %c0_i32, %c0_i32_0 : i32, i32
  }
  func.func @transform_2(%arg0: i32) -> (i32, i32) {
    %c0_i32 = arith.constant 0 : i32
    %c0_i32_0 = arith.constant 0 : i32
    %c0_i32_1 = arith.constant 0 : i32
    return %c0_i32, %c0_i32_0 : i32, i32
  }
  func.func @transform_3(%arg0: i32) -> (i32, i32) {
    %c0_i32 = arith.constant 0 : i32
    %c0_i32_0 = arith.constant 0 : i32
    %c0_i32_1 = arith.constant 0 : i32
    return %c0_i32, %c0_i32_0 : i32, i32
  }
  func.func @transform_4(%arg0: i32) -> (i32, i32) {
    %c0_i32 = arith.constant 0 : i32
    %c0_i32_0 = arith.constant 0 : i32
    %c0_i32_1 = arith.constant 0 : i32
    return %c0_i32, %c0_i32_0 : i32, i32
  }
  func.func @transform_5(%arg0: i32) -> (i32, i32) {
    %c0_i32 = arith.constant 0 : i32
    %c0_i32_0 = arith.constant 0 : i32
    %c0_i32_1 = arith.constant 0 : i32
    return %c0_i32, %c0_i32_0 : i32, i32
  }
  func.func @transform_6(%arg0: i32) -> (i32, i32) {
    %c0_i32 = arith.constant 0 : i32
    %c0_i32_0 = arith.constant 0 : i32
    %c0_i32_1 = arith.constant 0 : i32
    return %c0_i32, %c0_i32_0 : i32, i32
  }
  func.func @transform_7(%arg0: i32) -> (i32, i32, i32) {
    %c0_i32 = arith.constant 0 : i32
    %c0_i32_0 = arith.constant 0 : i32
    %c0_i32_1 = arith.constant 0 : i32
    return %arg0, %c0_i32, %c0_i32_0 : i32, i32, i32
  }
  func.func @transform_8(%arg0: i32) -> (i32, i32, i32) {
    %c0_i32 = arith.constant 0 : i32
    %c0_i32_0 = arith.constant 0 : i32
    %c0_i32_1 = arith.constant 0 : i32
    return %arg0, %c0_i32, %c0_i32_0 : i32, i32, i32
  }
}

module attributes {stable_mosaic.version = 11 : i64} {
  func.func @_ffn_block_kernel(%arg0: i32, %arg1: memref<16x32xbf16, #tpu.memory_space<vmem>>, %arg2: memref<32x64xbf16, #tpu.memory_space<vmem>>, %arg3: memref<1x64xf32, #tpu.memory_space<vmem>>, %arg4: memref<64x32xbf16, #tpu.memory_space<vmem>>, %arg5: memref<1x32xf32, #tpu.memory_space<vmem>>, %arg6: memref<1x32xf32, #tpu.memory_space<vmem>>, %arg7: memref<1x32xf32, #tpu.memory_space<vmem>>, %arg8: memref<16x32xbf16, #tpu.memory_space<vmem>>) attributes {dimension_semantics = [#tpu.dimension_semantics<parallel>], iteration_bounds = array<i64: 1>, scalar_prefetch = 0 : i64, scratch_operands = 0 : i64, tpu.core_type = #tpu.core_type<tc>, window_params = [{transform_indices = @transform_0, window_bounds = array<i64: 16, 32>}, {pipeline_mode = #tpu.pipeline_mode<synchronous>, transform_indices = @transform_1, window_bounds = array<i64: 32, 64>}, {pipeline_mode = #tpu.pipeline_mode<synchronous>, transform_indices = @transform_2, window_bounds = array<i64: 1, 64>}, {pipeline_mode = #tpu.pipeline_mode<synchronous>, transform_indices = @transform_3, window_bounds = array<i64: 64, 32>}, {pipeline_mode = #tpu.pipeline_mode<synchronous>, transform_indices = @transform_4, window_bounds = array<i64: 1, 32>}, {pipeline_mode = #tpu.pipeline_mode<synchronous>, transform_indices = @transform_5, window_bounds = array<i64: 1, 32>}, {pipeline_mode = #tpu.pipeline_mode<synchronous>, transform_indices = @transform_6, window_bounds = array<i64: 1, 32>}, {transform_indices = @transform_7, window_bounds = array<i64: 16, 32>}]} {
    %c0 = arith.constant 0 : index
    %c0_0 = arith.constant 0 : index
    %0 = vector.load %arg1[%c0, %c0_0] : memref<16x32xbf16, #tpu.memory_space<vmem>>, vector<16x32xbf16>
    %c0_1 = arith.constant 0 : index
    %c0_2 = arith.constant 0 : index
    %1 = vector.load %arg2[%c0_1, %c0_2] : memref<32x64xbf16, #tpu.memory_space<vmem>>, vector<32x64xbf16>
    %cst = arith.constant dense<0.000000e+00> : vector<16x64xf32>
    %2 = tpu.matmul %0, %1, %cst {dimension_numbers = #tpu.dot_dimension_numbers<[1], [0], [0], [1], [0, 0, 1, 1], [], []>} : vector<16x32xbf16>, vector<32x64xbf16>, vector<16x64xf32> -> vector<16x64xf32>
    %c0_3 = arith.constant 0 : index
    %c0_4 = arith.constant 0 : index
    %3 = vector.load %arg3[%c0_3, %c0_4] : memref<1x64xf32, #tpu.memory_space<vmem>>, vector<1x64xf32>
    %4 = vector.broadcast %3 : vector<1x64xf32> to vector<16x64xf32>
    %5 = arith.addf %2, %4 : vector<16x64xf32>
    %cst_5 = arith.constant 5.000000e-01 : f32
    %6 = vector.broadcast %cst_5 : f32 to vector<16x64xf32>
    %7 = arith.mulf %6, %5 : vector<16x64xf32>
    %cst_6 = arith.constant 4.471500e-02 : f32
    %8 = vector.broadcast %cst_6 : f32 to vector<16x64xf32>
    %9 = arith.mulf %8, %5 : vector<16x64xf32>
    %10 = arith.mulf %9, %5 : vector<16x64xf32>
    %11 = arith.mulf %10, %5 : vector<16x64xf32>
    %12 = arith.addf %5, %11 : vector<16x64xf32>
    %cst_7 = arith.constant 0.797884583 : f32
    %13 = vector.broadcast %cst_7 : f32 to vector<16x64xf32>
    %14 = arith.mulf %13, %12 : vector<16x64xf32>
    %15 = math.tanh %14 : vector<16x64xf32>
    %cst_8 = arith.constant 1.000000e+00 : f32
    %16 = vector.broadcast %cst_8 : f32 to vector<16x64xf32>
    %17 = arith.addf %16, %15 : vector<16x64xf32>
    %18 = arith.mulf %7, %17 : vector<16x64xf32>
    %19 = arith.truncf %18 : vector<16x64xf32> to vector<16x64xbf16>
    %c0_9 = arith.constant 0 : index
    %c0_10 = arith.constant 0 : index
    %20 = vector.load %arg4[%c0_9, %c0_10] : memref<64x32xbf16, #tpu.memory_space<vmem>>, vector<64x32xbf16>
    %cst_11 = arith.constant dense<0.000000e+00> : vector<16x32xf32>
    %21 = tpu.matmul %19, %20, %cst_11 {dimension_numbers = #tpu.dot_dimension_numbers<[1], [0], [0], [1], [0, 0, 1, 1], [], []>} : vector<16x64xbf16>, vector<64x32xbf16>, vector<16x32xf32> -> vector<16x32xf32>
    %c0_12 = arith.constant 0 : index
    %c0_13 = arith.constant 0 : index
    %22 = vector.load %arg5[%c0_12, %c0_13] : memref<1x32xf32, #tpu.memory_space<vmem>>, vector<1x32xf32>
    %23 = vector.broadcast %22 : vector<1x32xf32> to vector<16x32xf32>
    %24 = arith.addf %21, %23 : vector<16x32xf32>
    %25 = arith.extf %0 : vector<16x32xbf16> to vector<16x32xf32>
    %26 = arith.addf %24, %25 : vector<16x32xf32>
    %cst_14 = arith.constant dense<0.000000e+00> : vector<16xf32>
    %27 = vector.multi_reduction <add>, %26, %cst_14 [1] : vector<16x32xf32> to vector<16xf32>
    %28 = vector.shape_cast %27 : vector<16xf32> to vector<16x1xf32>
    %cst_15 = arith.constant 3.200000e+01 : f32
    %29 = vector.broadcast %cst_15 : f32 to vector<16x1xf32>
    %30 = arith.divf %28, %29 : vector<16x1xf32>
    %31 = vector.broadcast %30 : vector<16x1xf32> to vector<16x32xf32>
    %32 = arith.subf %26, %31 : vector<16x32xf32>
    %33 = arith.mulf %32, %32 : vector<16x32xf32>
    %cst_16 = arith.constant dense<0.000000e+00> : vector<16xf32>
    %34 = vector.multi_reduction <add>, %33, %cst_16 [1] : vector<16x32xf32> to vector<16xf32>
    %35 = vector.shape_cast %34 : vector<16xf32> to vector<16x1xf32>
    %cst_17 = arith.constant 3.200000e+01 : f32
    %36 = vector.broadcast %cst_17 : f32 to vector<16x1xf32>
    %37 = arith.divf %35, %36 : vector<16x1xf32>
    %38 = vector.broadcast %30 : vector<16x1xf32> to vector<16x32xf32>
    %39 = arith.subf %26, %38 : vector<16x32xf32>
    %cst_18 = arith.constant 9.99999996E-13 : f32
    %40 = vector.broadcast %cst_18 : f32 to vector<16x1xf32>
    %41 = arith.addf %37, %40 : vector<16x1xf32>
    %42 = math.rsqrt %41 : vector<16x1xf32>
    %43 = vector.broadcast %42 : vector<16x1xf32> to vector<16x32xf32>
    %44 = arith.mulf %39, %43 : vector<16x32xf32>
    %c0_19 = arith.constant 0 : index
    %c0_20 = arith.constant 0 : index
    %45 = vector.load %arg6[%c0_19, %c0_20] : memref<1x32xf32, #tpu.memory_space<vmem>>, vector<1x32xf32>
    %46 = vector.broadcast %45 : vector<1x32xf32> to vector<16x32xf32>
    %47 = arith.mulf %44, %46 : vector<16x32xf32>
    %c0_21 = arith.constant 0 : index
    %c0_22 = arith.constant 0 : index
    %48 = vector.load %arg7[%c0_21, %c0_22] : memref<1x32xf32, #tpu.memory_space<vmem>>, vector<1x32xf32>
    %49 = vector.broadcast %48 : vector<1x32xf32> to vector<16x32xf32>
    %50 = arith.addf %47, %49 : vector<16x32xf32>
    %51 = arith.truncf %50 : vector<16x32xf32> to vector<16x32xbf16>
    %c0_23 = arith.constant 0 : index
    %c0_24 = arith.constant 0 : index
    %52 = vector.load %arg8[%c0_23, %c0_24] : memref<16x32xbf16, #tpu.memory_space<vmem>>, vector<16x32xbf16>
    tpu.vector_store %arg8[%c0_23, %c0_24], %51 {strides = array<i32>} : memref<16x32xbf16, #tpu.memory_space<vmem>>, vector<16x32xbf16>,
    return
  }
  func.func @transform_0(%arg0: i32) -> (i32, i32) {
    %c0_i32 = arith.constant 0 : i32
    %c0_i32_0 = arith.constant 0 : i32
    return %arg0, %c0_i32 : i32, i32
  }
  func.func @transform_1(%arg0: i32) -> (i32, i32) {
    %c0_i32 = arith.constant 0 : i32
    %c0_i32_0 = arith.constant 0 : i32
    %c0_i32_1 = arith.constant 0 : i32
    return %c0_i32, %c0_i32_0 : i32, i32
  }
  func.func @transform_2(%arg0: i32) -> (i32, i32) {
    %c0_i32 = arith.constant 0 : i32
    %c0_i32_0 = arith.constant 0 : i32
    %c0_i32_1 = arith.constant 0 : i32
    return %c0_i32, %c0_i32_0 : i32, i32
  }
  func.func @transform_3(%arg0: i32) -> (i32, i32) {
    %c0_i32 = arith.constant 0 : i32
    %c0_i32_0 = arith.constant 0 : i32
    %c0_i32_1 = arith.constant 0 : i32
    return %c0_i32, %c0_i32_0 : i32, i32
  }
  func.func @transform_4(%arg0: i32) -> (i32, i32) {
    %c0_i32 = arith.constant 0 : i32
    %c0_i32_0 = arith.constant 0 : i32
    %c0_i32_1 = arith.constant 0 : i32
    return %c0_i32, %c0_i32_0 : i32, i32
  }
  func.func @transform_5(%arg0: i32) -> (i32, i32) {
    %c0_i32 = arith.constant 0 : i32
    %c0_i32_0 = arith.constant 0 : i32
    %c0_i32_1 = arith.constant 0 : i32
    return %c0_i32, %c0_i32_0 : i32, i32
  }
  func.func @transform_6(%arg0: i32) -> (i32, i32) {
    %c0_i32 = arith.constant 0 : i32
    %c0_i32_0 = arith.constant 0 : i32
    %c0_i32_1 = arith.constant 0 : i32
    return %c0_i32, %c0_i32_0 : i32, i32
  }
  func.func @transform_7(%arg0: i32) -> (i32, i32) {
    %c0_i32 = arith.constant 0 : i32
    %c0_i32_0 = arith.constant 0 : i32
    return %arg0, %c0_i32 : i32, i32
  }
}

module attributes {stable_mosaic.version = 11 : i64} {
  func.func @_layernorm_kernel(%arg0: i32, %arg1: memref<16x32xf32, #tpu.memory_space<vmem>>, %arg2: memref<1x32xf32, #tpu.memory_space<vmem>>, %arg3: memref<1x32xf32, #tpu.memory_space<vmem>>, %arg4: memref<16x32xbf16, #tpu.memory_space<vmem>>) attributes {dimension_semantics = [#tpu.dimension_semantics<parallel>], iteration_bounds = array<i64: 1>, scalar_prefetch = 0 : i64, scratch_operands = 0 : i64, tpu.core_type = #tpu.core_type<tc>, window_params = [{transform_indices = @transform_0, window_bounds = array<i64: 16, 32>}, {pipeline_mode = #tpu.pipeline_mode<synchronous>, transform_indices = @transform_1, window_bounds = array<i64: 1, 32>}, {pipeline_mode = #tpu.pipeline_mode<synchronous>, transform_indices = @transform_2, window_bounds = array<i64: 1, 32>}, {transform_indices = @transform_3, window_bounds = array<i64: 16, 32>}]} {
    %c0 = arith.constant 0 : index
    %c0_0 = arith.constant 0 : index
    %0 = vector.load %arg1[%c0, %c0_0] : memref<16x32xf32, #tpu.memory_space<vmem>>, vector<16x32xf32>
    %cst = arith.constant dense<0.000000e+00> : vector<16xf32>
    %1 = vector.multi_reduction <add>, %0, %cst [1] : vector<16x32xf32> to vector<16xf32>
    %2 = vector.shape_cast %1 : vector<16xf32> to vector<16x1xf32>
    %cst_1 = arith.constant 3.200000e+01 : f32
    %3 = vector.broadcast %cst_1 : f32 to vector<16x1xf32>
    %4 = arith.divf %2, %3 : vector<16x1xf32>
    %5 = vector.broadcast %4 : vector<16x1xf32> to vector<16x32xf32>
    %6 = arith.subf %0, %5 : vector<16x32xf32>
    %7 = arith.mulf %6, %6 : vector<16x32xf32>
    %cst_2 = arith.constant dense<0.000000e+00> : vector<16xf32>
    %8 = vector.multi_reduction <add>, %7, %cst_2 [1] : vector<16x32xf32> to vector<16xf32>
    %9 = vector.shape_cast %8 : vector<16xf32> to vector<16x1xf32>
    %cst_3 = arith.constant 3.200000e+01 : f32
    %10 = vector.broadcast %cst_3 : f32 to vector<16x1xf32>
    %11 = arith.divf %9, %10 : vector<16x1xf32>
    %12 = vector.broadcast %4 : vector<16x1xf32> to vector<16x32xf32>
    %13 = arith.subf %0, %12 : vector<16x32xf32>
    %cst_4 = arith.constant 9.99999996E-13 : f32
    %14 = vector.broadcast %cst_4 : f32 to vector<16x1xf32>
    %15 = arith.addf %11, %14 : vector<16x1xf32>
    %16 = math.rsqrt %15 : vector<16x1xf32>
    %17 = vector.broadcast %16 : vector<16x1xf32> to vector<16x32xf32>
    %18 = arith.mulf %13, %17 : vector<16x32xf32>
    %c0_5 = arith.constant 0 : index
    %c0_6 = arith.constant 0 : index
    %19 = vector.load %arg2[%c0_5, %c0_6] : memref<1x32xf32, #tpu.memory_space<vmem>>, vector<1x32xf32>
    %20 = vector.broadcast %19 : vector<1x32xf32> to vector<16x32xf32>
    %21 = arith.mulf %18, %20 : vector<16x32xf32>
    %c0_7 = arith.constant 0 : index
    %c0_8 = arith.constant 0 : index
    %22 = vector.load %arg3[%c0_7, %c0_8] : memref<1x32xf32, #tpu.memory_space<vmem>>, vector<1x32xf32>
    %23 = vector.broadcast %22 : vector<1x32xf32> to vector<16x32xf32>
    %24 = arith.addf %21, %23 : vector<16x32xf32>
    %25 = arith.truncf %24 : vector<16x32xf32> to vector<16x32xbf16>
    %c0_9 = arith.constant 0 : index
    %c0_10 = arith.constant 0 : index
    %26 = vector.load %arg4[%c0_9, %c0_10] : memref<16x32xbf16, #tpu.memory_space<vmem>>, vector<16x32xbf16>
    tpu.vector_store %arg4[%c0_9, %c0_10], %25 {strides = array<i32>} : memref<16x32xbf16, #tpu.memory_space<vmem>>, vector<16x32xbf16>,
    return
  }
  func.func @transform_0(%arg0: i32) -> (i32, i32) {
    %c0_i32 = arith.constant 0 : i32
    %c0_i32_0 = arith.constant 0 : i32
    return %arg0, %c0_i32 : i32, i32
  }
  func.func @transform_1(%arg0: i32) -> (i32, i32) {
    %c0_i32 = arith.constant 0 : i32
    %c0_i32_0 = arith.constant 0 : i32
    %c0_i32_1 = arith.constant 0 : i32
    return %c0_i32, %c0_i32_0 : i32, i32
  }
  func.func @transform_2(%arg0: i32) -> (i32, i32) {
    %c0_i32 = arith.constant 0 : i32
    %c0_i32_0 = arith.constant 0 : i32
    %c0_i32_1 = arith.constant 0 : i32
    return %c0_i32, %c0_i32_0 : i32, i32
  }
  func.func @transform_3(%arg0: i32) -> (i32, i32) {
    %c0_i32 = arith.constant 0 : i32
    %c0_i32_0 = arith.constant 0 : i32
    return %arg0, %c0_i32 : i32, i32
  }
}

</mosaic_0001>

<bundles_post_ra>
// kernel: bert_lstm_classification_forward.6
= control target key start
LH: loop header
LB: loop body
LE: loop exit
PB: predicated region body
PF: predicated region fallthrough
CT: control target
= control target key end

     0   :  { %vm16_vm0 = vcmask 261120   ;;  %vm70_vm1 = vcmask 257024   ;;  %s129_s0 = inlined_call_operand.vmem [shape: f32[16,32], index: 0, kind: input, shape index: {}]   ;;  %s130_s1 = inlined_call_operand.vmem [shape: f32[1,32], index: 1, kind: input, shape index: {}]   ;;  %s131_s2 = inlined_call_operand.vmem [shape: f32[1,32], index: 2, kind: input, shape index: {}]   ;;  %s132_s3 = inlined_call_operand.vmem [shape: bf16[16,32], index: 3, kind: output, shape index: {}]  }
   0x1   :  { %v14_v0 = vld [vmem:[%s129_s0] sm:$0xff]  ;;  %v15_v1 = vld [vmem:[%s129_s0 + $0x8] sm:$0xff] }
   0x2   :  { %v17_v2 = vsel %vm16_vm0, %v14_v0, 0.0  ;;  %v20_v3 = vsel %vm16_vm0, %v15_v1, 0.0  ;;  %v77_v21 = vld [vmem:[%s130_s1] ss:$0 sm:$0xff] }
   0x3   :  { %18 = vadd.xlane.f32.xlu0 %v17_v2  ;;  %v78_v23 = vld [vmem:[%s131_s2] ss:$0 sm:$0xff] }
   0x7   :  { %21 = vadd.xlane.f32.xlu0 %v20_v3 }
  0x8c   :  { %v19_v4 = vpop.xlane.xlu0 %18 }
  0x8d   :  { %v24_v5 = vmul.f32 0.03125, %v19_v4 }
  0x8f   :  { %v26_v6 = vsub.f32 %v14_v0, %v24_v5 }
  0x90   :  { %v22_v7 = vpop.xlane.xlu0 %21 }
  0x91   :  { %v25_v8 = vmul.f32 0.03125, %v22_v7  ;;  %v28_v9 = vmul.f32 %v26_v6, %v26_v6 }
  0x93   :  { %v27_v10 = vsub.f32 %v15_v1, %v25_v8  ;;  %v30_v11 = vsel %vm16_vm0, %v28_v9, 0.0 }
  0x94   :  { %31 = vadd.xlane.f32.xlu1 %v30_v11 }
  0x95   :  { %v29_v12 = vmul.f32 %v27_v10, %v27_v10 }
  0x97   :  { %v33_v13 = vsel %vm16_vm0, %v29_v12, 0.0 }
  0x98   :  { %34 = vadd.xlane.f32.xlu1 %v33_v13 }
 0x11d   :  { %v32_v14 = vpop.xlane.xlu1 %31 }
 0x11e   :  { %v36_v15 = vmul.f32 0.03125, %v32_v14 }
 0x120   :  { %v38_v16 = vadd.f32 1e-12, %v36_v15 }
 0x121   :  { %v35_v17 = vpop.xlane.xlu1 %34 }
 0x122   :  { %83 = vrsqrt.f32 %v38_v16  ;;  %v37_v18 = vmul.f32 0.03125, %v35_v17 }
 0x124   :  { %v39_v19 = vadd.f32 1e-12, %v37_v18 }
 0x126   :  { %85 = vrsqrt.f32 %v39_v19 }
 0x12f   :  { %v84_v20 = vpop.eup %83 }
 0x130   :  { %v42_v22 = vmul.f32 %v84_v20, %v26_v6 }
 0x132   :  { %v51_v24 = vmul.f32 %v77_v21, %v42_v22 }
 0x133   :  { %v86_v25 = vpop.eup %85 }
 0x134   :  { %v60_v26 = vadd.f32 %v78_v23, %v51_v24  ;;  %v43_v27 = vmul.f32 %v86_v25, %v27_v10 }
 0x136   :  { %v81_v28 = vpack.c.bf16 %v60_v26, %v60_v26  ;;  %v52_v29 = vmul.f32 %v77_v21, %v43_v27 }
 0x138   :  { %71 = vst.msk [vmem:[%s132_s3] sm:$0xf] %vm70_vm1, %v81_v28  ;;  %v61_v30 = vadd.f32 %v78_v23, %v52_v29 }
 0x13a   :  { %v82_v31 = vpack.c.bf16 %v61_v30, %v61_v30 }
 0x13c   :  { %72 = vst.msk [vmem:[%s132_s3 + $0x4] sm:$0xf] %vm70_vm1, %v82_v31 }

// kernel: bert_lstm_classification_forward.11
= control target key start
LH: loop header
LB: loop body
LE: loop exit
PB: predicated region body
PF: predicated region fallthrough
CT: control target
= control target key end

     0   :  { %v117_v0 = vmov 0.0   ;;  %vm118_vm0 = vmmov 0   ;;  %vm45_vm1 = vcmask 261120   ;;  %s157_s1 = inlined_call_operand.vmem [shape: bf16[32,128], index: 1, kind: input, shape index: {}]   ;;  %s158_s0 = inlined_call_operand.vmem [shape: bf16[16,32], index: 0, kind: input, shape index: {}]   ;;  %s159_s2 = inlined_call_operand.vmem [shape: f32[1,128], index: 2, kind: input, shape index: {}]   ;;  %s160_s3 = inlined_call_operand.vmem [shape: f32[16,128], index: 3, kind: output, shape index: {}]  }
   0x1   :  { %104 = vmatprep.subr.bf16.mxu0 %v117_v0  ;;  %v114_v1 = vld [vmem:[%s157_s1 + $0x8] sm:$0xff]   ;;  %108 = vmatprep.mubr.msk.bf16.mxu0 %vm118_vm0, %v117_v0  ;;  %v115_v2 = vld [vmem:[%s157_s1] sm:$0xff]  }
   0x2   :  { %105 = vmatpush3.bf16.msra.mxu0 %v114_v1  ;;  %v116_v3 = vld [vmem:[%s158_s0] sm:$0xff]  }
   0x3   :  { %106 = vmatprep.subr.bf16.mxu0 %v117_v0  ;;  %v96_v4 = vld [vmem:[%s159_s2] ss:$0 sm:$0xff] }
   0x6   :  { %107 = vmatpush3.bf16.msra.mxu0 %v115_v2 }
   0x9   :  { %109 = vmatmul.mubr.msk.bf16.vlgmr.msra.gmra.mxu0 %vm45_vm1, %v116_v3 }
  0xc9   :  { %v83_v5 = vpop.f32.mrf.mxu0 }
  0xca   :  { %v84_v6 = vadd.f32 %v96_v4, %v83_v5 }
  0xcb   :  { %v110_v7 = vpop.f32.mrf.mxu0 }
  0xcc   :  { %90 = vst [vmem:[%s160_s3] sm:$0xff] %v84_v6 }
  0xcd   :  { %v86_v8 = vpop.f32.mrf.mxu0 }
  0xce   :  { %v87_v9 = vadd.f32 %v96_v4, %v86_v8 }
  0xcf   :  { %v111_v10 = vpop.f32.mrf.mxu0 }
  0xd0   :  { %91 = vst [vmem:[%s160_s3 + $0x8] sm:$0xff] %v87_v9 }

// kernel: bert_lstm_classification_forward.8
= control target key start
LH: loop header
LB: loop body
LE: loop exit
PB: predicated region body
PF: predicated region fallthrough
CT: control target
= control target key end

     0   :  { %v332_v0 = vmov 0.0   ;;  %vm333_vm0 = vmmov 0   ;;  %vm57_vm1 = vcmask 261120   ;;  %vm160_vm2 = vcmask 523264   ;;  %s418_s1 = inlined_call_operand.vmem [shape: bf16[32,64], index: 1, kind: input, shape index: {}]   ;;  %s419_s0 = inlined_call_operand.vmem [shape: bf16[16,32], index: 0, kind: input, shape index: {}]   ;;  %s420_s3 = inlined_call_operand.vmem [shape: bf16[64,32], index: 3, kind: input, shape index: {}]   ;;  %s421_s2 = inlined_call_operand.vmem [shape: f32[1,64], index: 2, kind: input, shape index: {}]   ;;  %s422_s4 = inlined_call_operand.vmem [shape: f32[1,32], index: 4, kind: input, shape index: {}]   ;;  %s423_s5 = inlined_call_operand.vmem [shape: f32[1,32], index: 5, kind: input, shape index: {}]   ;;  %s424_s6 = inlined_call_operand.vmem [shape: f32[1,32], index: 6, kind: input, shape index: {}]   ;;  %s425_s7 = inlined_call_operand.vmem [shape: bf16[16,32], index: 7, kind: output, shape index: {}]  }
   0x1   :  { %294 = vmatprep.subr.bf16.mxu0 %v332_v0  ;;  %v316_v1 = vld [vmem:[%s418_s1 + $0x8] sm:$0xff]   ;;  %298 = vmatprep.mubr.msk.bf16.mxu0 %vm333_vm0, %v332_v0  ;;  %v317_v2 = vld [vmem:[%s418_s1] sm:$0xff]   ;;  %v319_v4 = vld [vmem:[%s420_s3 + $0x18] sm:$0xff]   ;;  %vm262_vm3 = vcmask 257024  }
   0x2   :  { %302 = vmatprep.subr.bf16.mxu1 %v332_v0  ;;  %310 = vmatprep.mubr.msk.bf16.mxu1 %vm333_vm0, %v332_v0  ;;  %v27_v3 = vld [vmem:[%s419_s0] sm:$0xff]   ;;  %v320_v5 = vld [vmem:[%s420_s3 + $0x10] sm:$0xff]   ;;  %v321_v6 = vld [vmem:[%s420_s3 + $0x8] sm:$0xff]  }
   0x3   :  { %295 = vmatpush3.bf16.msra.mxu0 %v316_v1  ;;  %303 = vmatpush3.bf16.msra.mxu1 %v319_v4  ;;  %v322_v7 = vld [vmem:[%s420_s3] sm:$0xff]   ;;  %v205_v35 = vunpack.c.l.bf16 %v27_v3  ;;  %v206_v40 = vunpack.c.h.bf16 %v27_v3 }
   0x4   :  { %296 = vmatprep.subr.bf16.mxu0 %v332_v0  ;;  %304 = vmatprep.subr.bf16.mxu1 %v332_v0  ;;  %v269_v8 = vld [vmem:[%s421_s2] ss:$0 sm:$0xff] }
   0x5   :  { %v274_v34 = vld [vmem:[%s422_s4] ss:$0 sm:$0xff] }
   0x7   :  { %297 = vmatpush3.bf16.msra.mxu0 %v317_v2  ;;  %305 = vmatpush3.bf16.msra.mxu1 %v320_v5  ;;  %v281_v2 = vld [vmem:[%s424_s6] ss:$0 sm:$0xff] }
   0x8   :  { %306 = vmatprep.subr.bf16.mxu1 %v332_v0 }
   0xa   :  { %299 = vmatmul.mubr.msk.bf16.vlgmr.msra.gmra.mxu0 %vm57_vm1, %v27_v3 }
   0xb   :  { %307 = vmatpush3.bf16.msra.mxu1 %v321_v6 }
   0xc   :  { %308 = vmatprep.subr.bf16.mxu1 %v332_v0  ;;  %v280_v0 = vld [vmem:[%s423_s5] ss:$0 sm:$0xff] }
   0xf   :  { %309 = vmatpush3.bf16.msra.mxu1 %v322_v7 }
  0xca   :  { %v95_v9 = vpop.f32.mrf.mxu0 }
  0xcb   :  { %v96_v10 = vadd.f32 %v269_v8, %v95_v9 }
  0xcc   :  { %v300_v11 = vpop.f32.mrf.mxu0 }
  0xcd   :  { %v104_v12 = vmul.f32 0.044715, %v96_v10  ;;  %v102_v28 = vmul.f32 0.5, %v96_v10 }
  0xce   :  { %v98_v13 = vpop.f32.mrf.mxu0 }
  0xcf   :  { %v106_v14 = vmul.f32 %v104_v12, %v96_v10  ;;  %v99_v15 = vadd.f32 %v269_v8, %v98_v13 }
  0xd0   :  { %v301_v16 = vpop.f32.mrf.mxu0 }
  0xd1   :  { %v108_v17 = vmul.f32 %v106_v14, %v96_v10  ;;  %v105_v18 = vmul.f32 0.044715, %v99_v15  ;;  %v103_v29 = vmul.f32 0.5, %v99_v15 }
  0xd3   :  { %v110_v19 = vadd.f32 %v108_v17, %v96_v10  ;;  %v107_v20 = vmul.f32 %v105_v18, %v99_v15 }
  0xd5   :  { %v112_v21 = vmul.f32 0.7978846, %v110_v19  ;;  %v109_v22 = vmul.f32 %v107_v20, %v99_v15 }
  0xd7   :  { %324 = vtanh.f32 %v112_v21  ;;  %v111_v23 = vadd.f32 %v109_v22, %v99_v15 }
  0xd9   :  { %v113_v24 = vmul.f32 0.7978846, %v111_v23 }
  0xdb   :  { %326 = vtanh.f32 %v113_v24 }
  0xe4   :  { %v325_v25 = vpop.eup %324 }
  0xe5   :  { %v116_v26 = vadd.f32 1.0, %v325_v25 }
  0xe7   :  { %v118_v31 = vmul.f32 %v116_v26, %v102_v28 }
  0xe8   :  { %v327_v27 = vpop.eup %326 }
  0xe9   :  { %v117_v30 = vadd.f32 1.0, %v327_v27 }
  0xeb   :  { %v119_v32 = vmul.f32 %v117_v30, %v103_v29 }
  0xed   :  { %v120_v33 = vpack.c.bf16 %v119_v32, %v118_v31 }
  0xef   :  { %311 = vmatmul.mubr.msk.bf16.vlgmr.msra.gmra.mxu1 %vm160_vm2, %v120_v33 }
 0x1af   :  { %v198_v36 = vpop.f32.mrf.mxu1 }
 0x1b0   :  { %v199_v37 = vadd.f32 %v274_v34, %v198_v36 }
 0x1b1   :  { %v312_v38 = vpop.f32.mrf.mxu1 }
 0x1b2   :  { %v207_v39 = vadd.f32 %v205_v35, %v199_v37 }
 0x1b3   :  { %v201_v41 = vpop.f32.mrf.mxu1 }
 0x1b4   :  { %v202_v42 = vadd.f32 %v274_v34, %v201_v41  ;;  %v209_v43 = vsel %vm57_vm1, %v207_v39, 0.0 }
 0x1b5   :  { %210 = vadd.xlane.f32.xlu0 %v209_v43  ;;  %v313_v44 = vpop.f32.mrf.mxu1 }
 0x1b6   :  { %v208_v45 = vadd.f32 %v206_v40, %v202_v42 }
 0x1b8   :  { %v212_v46 = vsel %vm57_vm1, %v208_v45, 0.0 }
 0x1b9   :  { %213 = vadd.xlane.f32.xlu0 %v212_v46 }
 0x23e   :  { %v211_v47 = vpop.xlane.xlu0 %210 }
 0x23f   :  { %v216_v48 = vmul.f32 0.03125, %v211_v47 }
 0x241   :  { %v218_v49 = vsub.f32 %v207_v39, %v216_v48 }
 0x242   :  { %v214_v50 = vpop.xlane.xlu0 %213 }
 0x243   :  { %v217_v51 = vmul.f32 0.03125, %v214_v50  ;;  %v220_v52 = vmul.f32 %v218_v49, %v218_v49 }
 0x245   :  { %v219_v53 = vsub.f32 %v208_v45, %v217_v51  ;;  %v222_v54 = vsel %vm57_vm1, %v220_v52, 0.0 }
 0x246   :  { %223 = vadd.xlane.f32.xlu1 %v222_v54 }
 0x247   :  { %v221_v55 = vmul.f32 %v219_v53, %v219_v53 }
 0x249   :  { %v225_v56 = vsel %vm57_vm1, %v221_v55, 0.0 }
 0x24a   :  { %226 = vadd.xlane.f32.xlu1 %v225_v56 }
 0x2cf   :  { %v224_v57 = vpop.xlane.xlu1 %223 }
 0x2d0   :  { %v228_v58 = vmul.f32 0.03125, %v224_v57 }
 0x2d2   :  { %v230_v59 = vadd.f32 1e-12, %v228_v58 }
 0x2d3   :  { %v227_v60 = vpop.xlane.xlu1 %226 }
 0x2d4   :  { %328 = vrsqrt.f32 %v230_v59  ;;  %v229_v61 = vmul.f32 0.03125, %v227_v60 }
 0x2d6   :  { %v231_v62 = vadd.f32 1e-12, %v229_v61 }
 0x2d8   :  { %330 = vrsqrt.f32 %v231_v62 }
 0x2e1   :  { %v329_v63 = vpop.eup %328 }
 0x2e2   :  { %v234_v1 = vmul.f32 %v329_v63, %v218_v49 }
 0x2e4   :  { %v243_v3 = vmul.f32 %v280_v0, %v234_v1 }
 0x2e5   :  { %v331_v4 = vpop.eup %330 }
 0x2e6   :  { %v252_v5 = vadd.f32 %v281_v2, %v243_v3  ;;  %v235_v6 = vmul.f32 %v331_v4, %v219_v53 }
 0x2e8   :  { %v284_v7 = vpack.c.bf16 %v252_v5, %v252_v5  ;;  %v244_v8 = vmul.f32 %v280_v0, %v235_v6 }
 0x2ea   :  { %263 = vst.msk [vmem:[%s425_s7] sm:$0xf] %vm262_vm3, %v284_v7  ;;  %v253_v9 = vadd.f32 %v281_v2, %v244_v8 }
 0x2ec   :  { %v285_v10 = vpack.c.bf16 %v253_v9, %v253_v9 }
 0x2ee   :  { %264 = vst.msk [vmem:[%s425_s7 + $0x4] sm:$0xf] %vm262_vm3, %v285_v10 }

// kernel: bert_lstm_classification_forward.7
= control target key start
LH: loop header
LB: loop body
LE: loop exit
PB: predicated region body
PF: predicated region fallthrough
CT: control target
= control target key end

     0   :  { %s1007_s27 = smov 0   ;;  %s1100_s0 = inlined_call_operand.vmem [shape: bf16[2,8,32], index: 0, kind: input, shape index: {}]   ;;  %s1101_s1 = inlined_call_operand.vmem [shape: bf16[32,96], index: 1, kind: input, shape index: {}]   ;;  %s1102_s2 = inlined_call_operand.vmem [shape: f32[1,96], index: 2, kind: input, shape index: {}]   ;;  %s1103_s3 = inlined_call_operand.vmem [shape: bf16[32,32], index: 3, kind: input, shape index: {}]   ;;  %s1104_s4 = inlined_call_operand.vmem [shape: f32[1,32], index: 4, kind: input, shape index: {}]   ;;  %s1105_s5 = inlined_call_operand.vmem [shape: f32[1,32], index: 5, kind: input, shape index: {}]   ;;  %s1106_s6 = inlined_call_operand.vmem [shape: f32[1,32], index: 6, kind: input, shape index: {}]   ;;  %s1107_s7 = inlined_call_operand.vmem [shape: f32[2,1,8], index: 7, kind: input, shape index: {}]   ;;  %s1108_s8 = inlined_call_operand.vmem [shape: bf16[2,8,32], index: 8, kind: output, shape index: {}]  }
   0x1 LB: > { %s832_s28 = sadd.s32 4294967295, %s953_s27   ;;  %p836_p0 = scmp.ge.s32.totalorder %s953_s27, 1  ;;  %s953_s27 = sphi %s1007_s27, %s18_s27  }
   0x2   : > { %p269_p1 = scmp.lt.s32.totalorder %s953_s27, 3 }
   0x4   : > { %p270_p2 = pnand %p836_p0, %p269_p1 }
   0x5   : > { %p304_p3 = scmp.lt.s32.totalorder (!%p270_p2), %s832_s28, 1  ;;  %s957_s17 = smov (!%p270_p2), 112  }
   0x6   : > { %273 = sbr.rel (%p270_p2) target bundleno = 1574 (0x626), region = 52  ;;  %s958_s18 = smov (!%p270_p2), 96  }
   0x7   : > { %s959_s19 = smov (!%p270_p2), 80   ;;  %s960_s23 = smov (!%p270_p2), 64  }
   0x8   : > { %s961_s24 = smov (!%p270_p2), 48  }
   0xb   : > { %v932_v0 = vld [vmem:[%s1101_s1 + $0x8] sm:$0xff]   ;;  %v955_v1 = vmov 0.0   ;;  %v933_v2 = vld [vmem:[%s1101_s1] sm:$0xff]   ;;  %vm956_vm0 = vmmov 0   ;;  %s1110_s28 = smov (!%p304_p3, %s832_s28), 1  ;;  %vm340_vm1 = vcmask 261120  }
   0xc   : > { %873 = vmatprep.subr.bf16.mxu0 %v955_v1  ;;  %881 = vmatprep.subr.bf16.mxu1 %v955_v1  ;;  %s837_s11 = sshll.u32 %s1110_s28, 2  ;;  %v839_v4 = vld [vmem:[%s1102_s2] ss:$0 sm:$0xff]  ;;  %vm385_vm2 = vcmask 781312   ;;  %vm394_vm3 = vcmask 130048   ;;  %s310_s22 = scalar_lea.vmem %s1107_s7, %s1110_s28  ;;  %vm449_vm4 = vcmask 64512  }
   0xd   : > { %874 = vmatpush3.bf16.msra.mxu0 %v932_v0  ;;  %877 = vmatprep.mubr.msk.bf16.mxu0 %vm956_vm0, %v955_v1  ;;  %s307_s14 = scalar_lea.vmem %s1100_s0, %s837_s11  ;;  %v845_v19 = vld [vmem:[%s310_s22] ss:$0 sm:$0xff]  ;;  %vm467_vm5 = vcmask 1043456   ;;  %v936_v56 = vld [vmem:[%s1103_s3 + $0x8] sm:$0xff]   ;;  %vm768_vm6 = vcmask 257024  }
   0xe   : > { %875 = vmatprep.subr.bf16.mxu0 %v955_v1  ;;  %883 = vmatprep.mubr.msk.bf16.mxu1 %vm956_vm0, %v955_v1  ;;  %v1037_v3 = vld [vmem:[%s307_s14] sm:$0xf] }
   0xf   : > { %v935_v55 = vld [vmem:[%s1103_s3] sm:$0xff]  }
  0x11   : > { %876 = vmatpush3.bf16.msra.mxu0 %v933_v2 }
  0x12   : > { %887 = vmatprep.subr.bf16.mxu0 %v955_v1 }
  0x14   : > { %878 = vmatmul.mubr.msk.bf16.vlgmr.msra.gmra.mxu0 %vm340_vm1, %v1037_v3 }
  0x15   : > { %889 = vmatprep.mubr.msk.bf16.mxu0 %vm956_vm0, %v955_v1 }
  0xd4   : > { %v378_v5 = vpop.f32.mrf.mxu0 }
  0xd5   : > { %v379_v6 = vadd.f32 %v839_v4, %v378_v5 }
  0xd6   : > { %v879_v7 = vpop.f32.mrf.mxu0 }
  0xd7   : > { %v384_v8 = vpack.c.bf16 %v379_v6, %v379_v6 }
  0xd8   : > { %v381_v9 = vpop.f32.mrf.mxu0 }
  0xd9   : > { %386 = vst.msk [vmem:[#allocation2] sm:$0xf] %vm385_vm2, %v384_v8  ;;  %v853_v9 = vld [vmem:[%s1104_s4] ss:$0 sm:$0xff] }
  0xda   : > { %v880_v10 = vpop.f32.mrf.mxu0 }
  0xe0   : > { %v388_v11 = vld [vmem:[#allocation2] sm:$0xf] }
  0xe1   : > { %v843_v12 = vcombine.low %v388_v11, %v388_v11 }
  0xe3   : > { %514 = vrot.lane.b32.xlu1 %v843_v12, %s957_s17  ;;  %392 = vrot.lane.b32.xlu0 %v843_v12, %s958_s18  ;;  %s314_s18 = scalar_lea.vmem %s1108_s8, %s837_s11 }
  0xe7   : > { %516 = vrot.lane.b32.xlu0 %v843_v12, %s959_s19 }
 0x155   : > { %v393_v13 = vpop.permute.xlu0 %392  ;;  %v515_v17 = vpop.permute.xlu1 %514 }
 0x156   : > { %v399_v14 = vsel %vm394_vm3, %v393_v13, 0 }
 0x157   : > { %882 = vmatpush3.bf16.xpose.msra.mxu1 %v399_v14 }
 0x158   : > { %893 = vmatprep.subr.bf16.mxu1 %v955_v1 }
 0x159   : > { %v517_v15 = vpop.permute.xlu0 %516 }
 0x15a   : > { %v522_v16 = vsel %vm394_vm3, %v517_v15, 0 }
 0x15e   : > { %884 = vmatmul.mubr.msk.bf16.vlgmr.msra.gmra.mxu1 %vm394_vm3, %v388_v11  ;;  %v735_v11 = vunpack.c.l.bf16 %v1037_v3 }
 0x15f   : > { %894 = vmatpush3.bf16.xpose.msra.mxu1 %v522_v16  ;;  %895 = vmatprep.mubr.msk.bf16.mxu1 %vm956_vm0, %v955_v1 }
 0x160   : > { %905 = vmatprep.subr.bf16.mxu1 %v955_v1 }
 0x166   : > { %896 = vmatmul.mubr.msk.bf16.vlgmr.msra.gmra.mxu1 %vm394_vm3, %v515_v17 }
 0x167   : > { %907 = vmatprep.mubr.msk.bf16.mxu1 %vm956_vm0, %v955_v1  ;;  %906 = vmatpush3.bf16.msra.mxu1 %v936_v56 }
 0x21e   : > { %v435_v18 = vpop.f32.mrf.mxu1 }
 0x21f   : > { %v441_v20 = vmul.f32 0.25, %v435_v18 }
 0x220   : > { %v885_v21 = vpop.f32.mrf.mxu1 }
 0x221   : > { %v448_v22 = vadd.f32 %v845_v19, %v441_v20 }
 0x222   : > { %v438_v23 = vpop.f32.mrf.mxu1 }
 0x223   : > { %v450_v24 = vsel %vm449_vm4, %v448_v22, -inf }
 0x224   : > { %451 = vmax.xlane.f32.xlu1 %v450_v24  ;;  %v886_v25 = vpop.f32.mrf.mxu1 }
 0x226   : > { %v558_v26 = vpop.f32.mrf.mxu1 }
 0x227   : > { %v564_v27 = vmul.f32 0.25, %v558_v26  ;;  %v854_v26 = vld [vmem:[%s1105_s5] ss:$0 sm:$0xff] }
 0x228   : > { %v897_v28 = vpop.f32.mrf.mxu1 }
 0x229   : > { %v565_v29 = vadd.f32 %v845_v19, %v564_v27  ;;  %v855_v28 = vld [vmem:[%s1106_s6] ss:$0 sm:$0xff] }
 0x22a   : > { %v561_v30 = vpop.f32.mrf.mxu1 }
 0x22b   : > { %v566_v31 = vsel %vm449_vm4, %v565_v29, -inf }
 0x22c   : > { %567 = vmax.xlane.f32.xlu0 %v566_v31  ;;  %v898_v32 = vpop.f32.mrf.mxu1 }
 0x2ad   : > { %v452_v33 = vpop.xlane.xlu1 %451 }
 0x2ae   : > { %v453_v34 = vsub.f32 %v448_v22, %v452_v33 }
 0x2b0   : > { %v454_v35 = vmul.f32 1.442695, %v453_v34 }
 0x2b2   : > { %937 = vpow2.f32 %v454_v35 }
 0x2b5   : > { %v568_v36 = vpop.xlane.xlu0 %567 }
 0x2b6   : > { %v569_v37 = vsub.f32 %v565_v29, %v568_v36 }
 0x2b8   : > { %v570_v38 = vmul.f32 1.442695, %v569_v37 }
 0x2ba   : > { %939 = vpow2.f32 %v570_v38 }
 0x2bf   : > { %v938_v39 = vpop.eup %937 }
 0x2c0   : > { %v456_v40 = vsel %vm449_vm4, %v938_v39, 0.0 }
 0x2c1   : > { %457 = vadd.xlane.f32.xlu0 %v456_v40 }
 0x2c7   : > { %v940_v41 = vpop.eup %939 }
 0x2c8   : > { %v572_v42 = vsel %vm449_vm4, %v940_v41, 0.0 }
 0x2c9   : > { %573 = vadd.xlane.f32.xlu1 %v572_v42 }
 0x2d7   : > { %462 = vrot.lane.b32.xlu0 %v843_v12, %s960_s23 }
 0x2da   : > { %578 = vrot.lane.b32.xlu1 %v843_v12, %s961_s24 }
 0x34a   : > { %v458_v43 = vpop.xlane.xlu0 %457 }
 0x34b   : > { %941 = vrcp.f32 %v458_v43 }
 0x34e   : > { %v463_v44 = vpop.permute.xlu0 %462 }
 0x34f   : > { %v469_v45 = vsel %vm467_vm5, %v463_v44, 0 }
 0x350   : > { %888 = vmatpush3.bf16.msra.mxu0 %v469_v45 }
 0x351   : > { %899 = vmatprep.subr.bf16.mxu0 %v955_v1 }
 0x352   : > { %v574_v46 = vpop.xlane.xlu1 %573 }
 0x353   : > { %943 = vrcp.f32 %v574_v46 }
 0x356   : > { %v579_v49 = vpop.permute.xlu1 %578 }
 0x357   : > { %v584_v51 = vsel %vm467_vm5, %v579_v49, 0 }
 0x358   : > { %v942_v47 = vpop.eup %941 }
 0x359   : > { %v460_v48 = vmul.f32 %v942_v47, %v938_v39 }
 0x35b   : > { %v461_v50 = vpack.c.bf16 %v460_v48, %v460_v48 }
 0x35d   : > { %890 = vmatmul.mubr.msk.bf16.vlgmr.msra.gmra.mxu0 %vm449_vm4, %v461_v50 }
 0x35e   : > { %900 = vmatpush3.bf16.msra.mxu0 %v584_v51  ;;  %901 = vmatprep.mubr.msk.bf16.mxu0 %vm956_vm0, %v955_v1 }
 0x35f   : > { %911 = vmatprep.subr.bf16.mxu0 %v955_v1 }
 0x360   : > { %v944_v52 = vpop.eup %943 }
 0x361   : > { %v576_v53 = vmul.f32 %v944_v52, %v940_v41 }
 0x363   : > { %v577_v54 = vpack.c.bf16 %v576_v53, %v576_v53 }
 0x365   : > { %902 = vmatmul.mubr.msk.bf16.vlgmr.msra.gmra.mxu0 %vm449_vm4, %v577_v54 }
 0x366   : > { %913 = vmatprep.mubr.msk.bf16.mxu0 %vm956_vm0, %v955_v1  ;;  %912 = vmatpush3.bf16.msra.mxu0 %v935_v55 }
 0x41d   : > { %v505_v57 = vpop.f32.mrf.mxu0 }
 0x41e   : > { %v511_v58 = vpack.c.bf16 %v505_v57, %v505_v57 }
 0x41f   : > { %v891_v59 = vpop.f32.mrf.mxu0 }
 0x420   : > { %914 = vmatmul.mubr.msk.bf16.vlgmr.msra.gmra.mxu0 %vm394_vm3, %v511_v58 }
 0x421   : > { %v508_v60 = vpop.f32.mrf.mxu0 }
 0x423   : > { %v892_v61 = vpop.f32.mrf.mxu0 }
 0x425   : > { %v620_v62 = vpop.f32.mrf.mxu0 }
 0x426   : > { %v626_v63 = vpack.c.bf16 %v620_v62, %v620_v62 }
 0x427   : > { %v903_v0 = vpop.f32.mrf.mxu0 }
 0x428   : > { %908 = vmatmul.mubr.msk.bf16.vlgmr.msra.gmra.mxu1 %vm394_vm3, %v626_v63 }
 0x429   : > { %v623_v1 = vpop.f32.mrf.mxu0 }
 0x42b   : > { %v904_v2 = vpop.f32.mrf.mxu0 }
 0x4e0   : > { %v721_v4 = vpop.f32.mrf.mxu0 }
 0x4e2   : > { %v915_v5 = vpop.f32.mrf.mxu0 }
 0x4e4   : > { %v724_v6 = vpop.f32.mrf.mxu0 }
 0x4e6   : > { %v916_v7 = vpop.f32.mrf.mxu0 }
 0x4e8   : > { %v672_v8 = vpop.f32.mrf.mxu1 }
 0x4e9   : > { %v722_v10 = vadd.f32 %v721_v4, %v672_v8 }
 0x4ea   : > { %v909_v12 = vpop.f32.mrf.mxu1 }
 0x4eb   : > { %v734_v13 = vadd.f32 %v853_v9, %v722_v10 }
 0x4ec   : > { %v675_v14 = vpop.f32.mrf.mxu1 }
 0x4ed   : > { %v736_v15 = vadd.f32 %v735_v11, %v734_v13 }
 0x4ee   : > { %v910_v16 = vpop.f32.mrf.mxu1 }
 0x4ef   : > { %v737_v17 = vsel %vm340_vm1, %v736_v15, 0.0 }
 0x4f0   : > { %738 = vadd.xlane.f32.xlu1 %v737_v17 }
 0x579   : > { %v739_v18 = vpop.xlane.xlu1 %738 }
 0x57a   : > { %v741_v19 = vmul.f32 0.03125, %v739_v18 }
 0x57c   : > { %v742_v20 = vsub.f32 %v736_v15, %v741_v19 }
 0x57e   : > { %v743_v21 = vmul.f32 %v742_v20, %v742_v20 }
 0x580   : > { %v744_v22 = vsel %vm340_vm1, %v743_v21, 0.0 }
 0x581   : > { %745 = vadd.xlane.f32.xlu0 %v744_v22 }
 0x60a   : > { %v746_v23 = vpop.xlane.xlu0 %745 }
 0x60b   : > { %v747_v24 = vmul.f32 0.03125, %v746_v23 }
 0x60d   : > { %v748_v25 = vadd.f32 1e-12, %v747_v24 }
 0x60f   : > { %945 = vrsqrt.f32 %v748_v25 }
 0x61c   : > { %v946_v3 = vpop.eup %945 }
 0x61d   : > { %v750_v27 = vmul.f32 %v946_v3, %v742_v20 }
 0x61f   : > { %v758_v29 = vmul.f32 %v854_v26, %v750_v27 }
 0x621   : > { %v766_v30 = vadd.f32 %v855_v28, %v758_v29 }
 0x623   : > { %v767_v31 = vpack.c.bf16 %v766_v30, %v766_v30 }
 0x625   : > { %769 = vst.msk [vmem:[%s314_s18] sm:$0xf] %vm768_vm6, %v767_v31 }
 0x626 PF: > { %s18_s27 = sadd.s32 1, %s953_s27  }
 0x627   : > { %p15_p4 = scmp.ge.s32.totalorder %s18_s27, 4  }
 0x629   :  { %17 = sbr.rel (!%p15_p4) target bundleno = 1 (0x1), region = 85 }

</bundles_post_ra>
